<compile_context>
chip_gen: v7x
topology: tpu7x:2x2x1
jax: 0.10.0
libtpu: 0.0.40
codegen_flags: <defaults>
</compile_context>

<pallas_src>
import functools

import jax
import jax.numpy as jnp
from jax.experimental import pallas as pl
from jax.experimental.pallas import tpu as pltpu


def _round_up(v, m):
    return (v + m - 1) // m * m


def _splitnet_kernel(x_ref, w_ref, b_ref, o_ref, *, activation):
    # x: [tm, D_in] (compute dtype), w: [D_in, tn] (compute dtype),
    # b: [1, tn] f32, o: [tm, tn] output dtype.
    y = jnp.dot(x_ref[...], w_ref[...], preferred_element_type=jnp.float32)
    y = y + b_ref[...]
    if activation == "tanh":
        y = jnp.tanh(y)          # EUP op — overlaps with MXU/DMA
    elif activation == "relu":
        y = jnp.maximum(y, 0.0)  # VPU op
    o_ref[...] = y.astype(o_ref.dtype)


def prepare_splitnet_params(weights, biases, compute_dtype=jnp.bfloat16):
    """Concatenate per-head params once, zero-pad D_out to a multiple of 128
    (lane-dense output slab), cast W to the MXU compute dtype. Do at init."""
    w = jnp.concatenate(weights, axis=-1)            # [D_in, D_out]
    b = jnp.concatenate(biases, axis=-1)             # [D_out]
    d_out = w.shape[-1]
    d_pad = _round_up(d_out, 128)
    if d_pad != d_out:
        w = jnp.pad(w, ((0, 0), (0, d_pad - d_out)))
        b = jnp.pad(b, ((0, d_pad - d_out),))
    w = w.astype(compute_dtype)
    b = b.astype(jnp.float32)[None, :]               # bias add stays in f32
    return w, b, d_out


def splitnet_forward(x, w, b, d_out, activation=None, *,
                     compute_dtype=jnp.bfloat16, tm=512, tn=256):
    """Fused SplitNet forward.  w/b/d_out come from prepare_splitnet_params."""
    orig_shape = x.shape
    out_dtype = x.dtype
    x2 = x.reshape(-1, orig_shape[-1]) if x.ndim != 2 else x
    B, D_in = x2.shape
    D_pad = w.shape[-1]

    if x2.dtype != compute_dtype:
        x2 = x2.astype(compute_dtype)

    # Output-column (N) tiling: keeps W streaming, bounds VMEM per generation.
    tn_eff = min(tn, D_pad)                 # multiple of 128 by construction
    n_col = pl.cdiv(D_pad, tn_eff)

    # Row (M) tiling.  Guarantee >=2 grid steps on a parallel axis when the
    # batch is small and there is only one N tile, so both v7x TCs get work.
    if B > tm:
        tm_eff = tm
    elif B > 8 and n_col < 2:
        tm_eff = _round_up(pl.cdiv(B, 2), 8)
    else:
        tm_eff = B
    n_row = pl.cdiv(B, tm_eff)
    grid = (n_row, n_col)

    # VMEM budget from the actual tiles (double-buffered) + f32 temps + slack.
    c_bytes = jnp.dtype(compute_dtype).itemsize
    o_bytes = jnp.dtype(out_dtype).itemsize
    tile_bytes = (tm_eff * D_in * c_bytes          # x tile
                  + D_in * tn_eff * c_bytes        # W tile
                  + tn_eff * 4                     # bias tile
                  + tm_eff * tn_eff * o_bytes)     # out tile
    vmem_bytes = 2 * tile_bytes + tm_eff * tn_eff * 4 + (2 << 20)
    vmem_bytes = int(min(64 * 2**20, max(vmem_bytes, 8 * 2**20)))

    kernel = functools.partial(_splitnet_kernel, activation=activation)

    out = pl.pallas_call(
        kernel,
        out_shape=jax.ShapeDtypeStruct((B, D_pad), out_dtype),
        grid_spec=pltpu.PrefetchScalarGridSpec(
            num_scalar_prefetch=0,
            grid=grid,
            in_specs=[
                pl.BlockSpec((tm_eff, D_in), lambda i, j: (i, 0)),   # x rows
                pl.BlockSpec((D_in, tn_eff), lambda i, j: (0, j)),   # W cols
                pl.BlockSpec((1, tn_eff), lambda i, j: (0, j)),      # bias cols
            ],
            out_specs=pl.BlockSpec((tm_eff, tn_eff), lambda i, j: (i, j)),
        ),
        compiler_params=pltpu.CompilerParams(
            dimension_semantics=("parallel", "parallel"),
            vmem_limit_bytes=vmem_bytes,
        ),
    )(x2, w, b)

    if d_out != D_pad:
        out = out[:, :d_out]
    return out.reshape(*orig_shape[:-1], d_out)


class SplitNetJax:
    """Minimal JAX-side mirror of the PyTorch SplitNet module."""

    def __init__(self, input_size, output_sizes, activation=None, *,
                 compute_dtype=jnp.bfloat16, key):
        self.input_size = input_size
        self.output_sizes = tuple(output_sizes)
        self.activation = activation          # None | "tanh" | "relu"
        self.compute_dtype = compute_dtype
        self.weights = []
        self.biases = []
        bound = float(input_size) ** -0.5     # torch.nn.Linear default init
        for out_size in self.output_sizes:
            key, wk, bk = jax.random.split(key, 3)
            w = jax.random.uniform(wk, (input_size, out_size), jnp.float32,
                                   minval=-bound, maxval=bound)
            b = jax.random.uniform(bk, (out_size,), jnp.float32,
                                   minval=-bound, maxval=bound)
            self.weights.append(w)
            self.biases.append(b)
        # Concatenate / pad / cast ONCE — no per-forward weight re-materialize.
        self._w, self._b, self._d_out = prepare_splitnet_params(
            self.weights, self.biases, compute_dtype)

    def forward(self, x):
        return splitnet_forward(x, self._w, self._b, self._d_out,
                                self.activation,
                                compute_dtype=self.compute_dtype)


def splitnet_reference(x, weights, biases, activation=None):
    """Pure-JAX f32 reference matching the PyTorch forward (per-head, concat)."""
    outs = []
    for w, b in zip(weights, biases):
        y = x @ w + b
        if activation == "tanh":
            y = jnp.tanh(y)
        elif activation == "relu":
            y = jnp.maximum(y, 0.0)
        outs.append(y)
    return jnp.concatenate(outs, axis=-1)


if __name__ == "__main__":
    key = jax.random.PRNGKey(0)
    key, xk, xk2, mk = jax.random.split(key, 4)

    # Small deterministic shapes.  Heads of 48 + 40 -> D_out = 88, which gets
    # zero-padded to 128 (exercises the lane-dense padding + final slice).
    input_size = 32
    output_sizes = (48, 40)
    d_out = sum(output_sizes)

    x3d = jax.random.normal(xk, (2, 4, input_size), jnp.float32)   # 8 rows
    x2d = jax.random.normal(xk2, (40, input_size), jnp.float32)    # row-tiled

    # bf16 compute path (default; right target for v6e/v7x MXU + HBM roofline).
    net_bf16 = SplitNetJax(input_size, output_sizes, activation="tanh",
                           compute_dtype=jnp.bfloat16, key=mk)
    out_bf16 = jax.block_until_ready(net_bf16.forward(x3d))
    ref_f32 = splitnet_reference(x3d, net_bf16.weights, net_bf16.biases, "tanh")
    assert out_bf16.shape == (2, 4, d_out), out_bf16.shape
    assert out_bf16.dtype == jnp.float32
    assert bool(jnp.allclose(out_bf16, ref_f32, atol=6e-2)), (
        float(jnp.max(jnp.abs(out_bf16 - ref_f32))))

    # f32 compute path: exact parity with the torch-style f32 reference.
    net_f32 = SplitNetJax(input_size, output_sizes, activation="tanh",
                          compute_dtype=jnp.float32, key=mk)
    out_f32 = jax.block_until_ready(net_f32.forward(x3d))
    ref_f32b = splitnet_reference(x3d, net_f32.weights, net_f32.biases, "tanh")
    assert bool(jnp.allclose(out_f32, ref_f32b, atol=1e-5, rtol=1e-5)), (
        float(jnp.max(jnp.abs(out_f32 - ref_f32b))))

    # Larger 2-D batch: exercises the >=2 row-tile split (v7x megacore) and a
    # partial last row tile (40 = 24 + 16, masked store on the remainder).
    out2 = jax.block_until_ready(net_f32.forward(x2d))
    ref2 = splitnet_reference(x2d, net_f32.weights, net_f32.biases, "tanh")
    assert out2.shape == (40, d_out), out2.shape
    assert bool(jnp.allclose(out2, ref2, atol=1e-5, rtol=1e-5)), (
        float(jnp.max(jnp.abs(out2 - ref2))))

    # TODO(synk): only None/tanh/relu activations are fused; arbitrary torch
    # activation classes would need their own branch in the kernel body.

    print("KERNEL_OK")
</pallas_src>

<mosaic_0001>
module attributes {stable_mosaic.version = 11 : i64} {
  func.func @_splitnet_kernel(%arg0: i32, %arg1: i32, %arg2: memref<8x32xbf16, #tpu.memory_space<vmem>>, %arg3: memref<32x128xbf16, #tpu.memory_space<vmem>>, %arg4: memref<1x128xf32, #tpu.memory_space<vmem>>, %arg5: memref<8x128xf32, #tpu.memory_space<vmem>>) attributes {dimension_semantics = [#tpu.dimension_semantics<parallel>, #tpu.dimension_semantics<parallel>], iteration_bounds = array<i64: 1, 1>, scalar_prefetch = 0 : i64, scratch_operands = 0 : i64, tpu.core_type = #tpu.core_type<tc>, window_params = [{transform_indices = @transform_0, window_bounds = array<i64: 8, 32>}, {transform_indices = @transform_1, window_bounds = array<i64: 32, 128>}, {transform_indices = @transform_2, window_bounds = array<i64: 1, 128>}, {transform_indices = @transform_3, window_bounds = array<i64: 8, 128>}]} {
    %c0 = arith.constant 0 : index
    %c0_0 = arith.constant 0 : index
    %0 = vector.load %arg2[%c0, %c0_0] : memref<8x32xbf16, #tpu.memory_space<vmem>>, vector<8x32xbf16>
    %c0_1 = arith.constant 0 : index
    %c0_2 = arith.constant 0 : index
    %1 = vector.load %arg3[%c0_1, %c0_2] : memref<32x128xbf16, #tpu.memory_space<vmem>>, vector<32x128xbf16>
    %cst = arith.constant dense<0.000000e+00> : vector<8x128xf32>
    %2 = tpu.matmul %0, %1, %cst {dimension_numbers = #tpu.dot_dimension_numbers<[1], [0], [0], [1], [0, 0, 1, 1], [], []>} : vector<8x32xbf16>, vector<32x128xbf16>, vector<8x128xf32> -> vector<8x128xf32>
    %c0_3 = arith.constant 0 : index
    %c0_4 = arith.constant 0 : index
    %3 = vector.load %arg4[%c0_3, %c0_4] : memref<1x128xf32, #tpu.memory_space<vmem>>, vector<1x128xf32>
    %4 = vector.broadcast %3 : vector<1x128xf32> to vector<8x128xf32>
    %5 = arith.addf %2, %4 : vector<8x128xf32>
    %6 = math.tanh %5 : vector<8x128xf32>
    %c0_5 = arith.constant 0 : index
    %c0_6 = arith.constant 0 : index
    %7 = vector.load %arg5[%c0_5, %c0_6] : memref<8x128xf32, #tpu.memory_space<vmem>>, vector<8x128xf32>
    tpu.vector_store %arg5[%c0_5, %c0_6], %6 {strides = array<i32>} : memref<8x128xf32, #tpu.memory_space<vmem>>, vector<8x128xf32>,
    return
  }
  func.func @transform_0(%arg0: i32, %arg1: i32) -> (i32, i32) {
    %c0_i32 = arith.constant 0 : i32
    %c0_i32_0 = arith.constant 0 : i32
    return %arg0, %c0_i32 : i32, i32
  }
  func.func @transform_1(%arg0: i32, %arg1: i32) -> (i32, i32) {
    %c0_i32 = arith.constant 0 : i32
    %c0_i32_0 = arith.constant 0 : i32
    return %c0_i32, %arg1 : i32, i32
  }
  func.func @transform_2(%arg0: i32, %arg1: i32) -> (i32, i32) {
    %c0_i32 = arith.constant 0 : i32
    %c0_i32_0 = arith.constant 0 : i32
    return %c0_i32, %arg1 : i32, i32
  }
  func.func @transform_3(%arg0: i32, %arg1: i32) -> (i32, i32) {
    %c0_i32 = arith.constant 0 : i32
    return %arg0, %arg1 : i32, i32
  }
}

</mosaic_0001>

<bundles_post_ra>
// kernel: tpu_custom_call.1
= control target key start
LH: loop header
LB: loop body
LE: loop exit
PB: predicated region body
PF: predicated region fallthrough
CT: control target
= control target key end

     0   :  { %8 = vsyncpa [#allocation3], 0  ;;  %s299_s0 = inlined_call_operand.hbm [shape: bf16[8,32], index: 0, kind: input, shape index: {}]   ;;  %s300_s1 = inlined_call_operand.hbm [shape: bf16[32,128], index: 1, kind: input, shape index: {}]   ;;  %s301_s2 = inlined_call_operand.vmem [shape: f32[1,128], index: 2, kind: input, shape index: {}]   ;;  %s302_s3 = inlined_call_operand.hbm [shape: f32[8,128], index: 3, kind: output, shape index: {}]  }
   0x1   :  { %9 = vsyncpa [#allocation6], 0 }
   0x2   :  { %10 = vsyncpa [#allocation4], 0  ;;  %s226_s12 = smov [#allocation2]   ;;  %s227_s14 = smov [#allocation5]  }
   0x3   :  { %s17_s13 = sshll.u32 %s226_s12, 4  ;;  %s26_s15 = sshll.u32 %s227_s14, 4  ;;  %s18_s13 = int_to_ptr.vmem [resolvable:$true] %s17_s13  ;;  %s253_s15 = int_to_ptr.vmem [resolvable:$true] %s26_s15 }
   0x4   :  { %s154_s18 = scalar_lea.hbm %s299_s0, 64 }
   0x5   :  { %p155_p0 = scmp.ne.s32.totalorder %s299_s0, %s154_s18  ;;  %p158_p1 = scmp.lt.u32.totalorder %s154_s18, %s299_s0 }
   0x7   :  { %p160_p2 = pnand %p158_p1, %p155_p0 }
   0x9   :  { %163 = shalt.err (!%p160_p2)
}
   0xa   :  { %s164_s23 = scalar_lea.vmem %s18_s13, 64  ;;  %p169_p4 = scmp.lt.s32.totalorder %s18_s13, %s18_s13 }
   0xb   :  { %p165_p3 = scmp.ne.s32.totalorder %s18_s13, %s164_s23  ;;  %p170_p5 = scmp.lt.s32.totalorder %s164_s23, %s164_s23 }
   0xd   :  { %p171_p6 = por %p170_p5, %p169_p4 }
   0xf   :  { %p172_p7 = pnand %p171_p6, %p165_p3 }
  0x11   :  { %175 = shalt.err (!%p172_p7)
}
  0x12   :  { %20 = dma.hbm_to_vmem [thread:$0]  %s299_s0, 64, %s18_s13, [#allocation3]  }
  0x13   :  { %s176_s28 = scalar_lea.hbm %s300_s1, 256 }
  0x14   :  { %p177_p8 = scmp.ne.s32.totalorder %s300_s1, %s176_s28  ;;  %p180_p9 = scmp.lt.u32.totalorder %s176_s28, %s300_s1 }
  0x16   :  { %p182_p10 = pnand %p180_p9, %p177_p8 }
  0x18   :  { %185 = shalt.err (!%p182_p10)
}
  0x19   :  { %s186_s6 = scalar_lea.vmem %s253_s15, 256  ;;  %p191_p12 = scmp.lt.s32.totalorder %s253_s15, %s253_s15 }
  0x1a   :  { %p187_p11 = scmp.ne.s32.totalorder %s253_s15, %s186_s6  ;;  %p192_p13 = scmp.lt.s32.totalorder %s186_s6, %s186_s6 }
  0x1c   :  { %p193_p0 = por %p192_p13, %p191_p12 }
  0x1e   :  { %p194_p1 = pnand %p193_p0, %p187_p11 }
  0x20   :  { %197 = shalt.err (!%p194_p1)
}
  0x21   :  { %s228_s0 = smov 64   ;;  %s229_s7 = smov 4  }
  0x22   :  { %32 = dma.hbm_to_vmem [thread:$0]  %s300_s1, 256, %s253_s15, [#allocation6], %s228_s0, %s228_s0, %s229_s7  }
  0x23   :  { %220 = dma.done.wait [#allocation3], 64  }
  0x24   :  { %221 = vsyncadd [#allocation3], 4294967232 }
  0x25   :  { %222 = dma.done.wait [#allocation6], 256  }
  0x26   :  { %223 = vsyncadd [#allocation6], 4294967040  ;;  %v230_v0 = vmov 0.0   ;;  %vm231_vm0 = vmmov 0   ;;  %v150_v1 = vld [vmem:[#allocation5] sm:$0xff]   ;;  %v151_v2 = vld [vmem:[#allocation5 + $0x8] sm:$0xff]  }
  0x27   :  { %135 = vmatprep.subr.bf16.mxu0 %v230_v0  ;;  %139 = vmatprep.mubr.msk.bf16.mxu0 %vm231_vm0, %v230_v0  ;;  %v42_v3 = vld [vmem:[#allocation2] sm:$0xf]  ;;  %vm66_vm1 = vcmask 261120   ;;  %s232_s1 = smov [#allocation7]  }
  0x28   :  { %136 = vmatpush3.bf16.msra.mxu0 %v150_v1  ;;  %v128_v4 = vld [vmem:[%s301_s2] ss:$0 sm:$0xff]  ;;  %s118_s12 = sshll.u32 %s232_s1, 4  ;;  %s119_s12 = int_to_ptr.vmem [resolvable:$true] %s118_s12 }
  0x29   :  { %137 = vmatprep.subr.bf16.mxu0 %v230_v0  ;;  %s198_s13 = scalar_lea.vmem %s119_s12, 128  ;;  %p203_p3 = scmp.lt.s32.totalorder %s119_s12, %s119_s12 }
  0x2a   :  { %p199_p2 = scmp.ne.s32.totalorder %s119_s12, %s198_s13  ;;  %p204_p4 = scmp.lt.s32.totalorder %s198_s13, %s198_s13 }
  0x2c   :  { %138 = vmatpush3.bf16.msra.mxu0 %v151_v2  ;;  %p205_p5 = por %p204_p4, %p203_p3 }
  0x2e   :  { %p206_p6 = pnand %p205_p5, %p199_p2 }
  0x2f   :  { %140 = vmatmul.mubr.msk.bf16.vlgmr.msra.gmra.mrb[0].mxu0 %vm66_vm1, %v42_v3 }
 0x102   :  { %v104_v5 = vpop.f32.mrb[0].mxu0 }
 0x103   :  { %v105_v6 = vadd.f32 %v128_v4, %v104_v5  ;;  %v141_v7 = vpop.f32.mrb[1].mxu0 }
 0x104   :  { %v107_v8 = vpop.f32.mrb[2].mxu0 }
 0x105   :  { %152 = vtanh.f32 %v105_v6  ;;  %v142_v9 = vpop.f32.mrb[3].mxu0 }
 0x10f   :  { %v153_v10 = vpop.eup %152 }
 0x110   :  { %111 = vst [vmem:[#allocation7] sm:$0xff] %v153_v10 }
 0x111   :  { %209 = shalt.err (!%p206_p6)
}
 0x112   :  { %s210_s15 = scalar_lea.hbm %s302_s3, 128 }
 0x113   :  { %p211_p7 = scmp.ne.s32.totalorder %s302_s3, %s210_s15  ;;  %p214_p8 = scmp.lt.u32.totalorder %s210_s15, %s302_s3 }
 0x115   :  { %p216_p9 = pnand %p214_p8, %p211_p7 }
 0x117   :  { %219 = shalt.err (!%p216_p9)
}
 0x118   :  { %121 = dma.vmem_to_hbm [thread:$0]  %s119_s12, 128, %s302_s3, [#allocation4]  }
 0x119   :  { %224 = dma.done.wait [#allocation4], 128  }
 0x11a   :  { %225 = vsyncadd [#allocation4], 4294967168 }
 0x11b   :  { %125 = vsyncpa [#allocation3], 1 }
 0x11c   :  { %126 = vsyncpa [#allocation6], 1 }
 0x11d   :  { %127 = vsyncpa [#allocation4], 1 }

</bundles_post_ra>
